<compile_context>
chip_gen: v7x
topology: tpu7x:2x2x1
jax: 0.10.0
libtpu: 0.0.40
codegen_flags: <defaults>
</compile_context>

<pallas_src>
import functools
import math

import jax
import jax.numpy as jnp
from jax.experimental import pallas as pl
from jax.experimental.pallas import tpu as pltpu


# --------------------------------------------------------------------------
# Kernel bodies
# --------------------------------------------------------------------------

def _channel_gate(x, w1_ref, b1_ref, w2_ref, b2_ref, *, inv_hw):
    """sigmoid(bottleneck(avg_pool(x)) + bottleneck(max_pool(x))) -> (Bt, C)."""
    bt = x.shape[0]
    xf = x.astype(jnp.float32)

    # Global avg / max pooling as single lane-axis (HW) reductions.
    avg = jnp.sum(xf, axis=-1) * inv_hw                # (Bt, C)
    mxp = jnp.max(xf, axis=-1)                         # (Bt, C)

    # Stack avg/max rows so the bottleneck MLP runs once on (2*Bt, C).
    v = jnp.concatenate([avg, mxp], axis=0)            # (2Bt, C)

    # Bottleneck MLP (C -> M -> C), PyTorch-layout weights (out_features, in_features).
    # C and M are tiny (8 and 2): broadcast-FMA + small reductions on the
    # VPU/XLU avoid pushing two <1%-utilization matmuls through the MXU.
    w1 = w1_ref[...].astype(jnp.float32)               # (M, C)
    b1 = b1_ref[...].astype(jnp.float32)               # (1, M)
    w2 = w2_ref[...].astype(jnp.float32)               # (C, M)
    b2 = b2_ref[...].astype(jnp.float32)               # (1, C)

    h = jnp.sum(v[:, None, :] * w1[None, :, :], axis=-1) + b1     # (2Bt, M)
    h = jnp.maximum(h, 0.0)                                       # ReLU
    y = jnp.sum(h[:, None, :] * w2[None, :, :], axis=-1) + b2     # (2Bt, C)
    pool_sum = y[:bt] + y[bt:]                                    # (Bt, C)

    # Exact, numerically-stable sigmoid (single EUP exp; no approx reciprocal —
    # that was the source of the previous fused-path mismatch).
    z = jnp.exp(-jnp.abs(pool_sum))
    return jnp.where(pool_sum >= 0.0, 1.0 / (1.0 + z), z / (1.0 + z))


def _gate_kernel(x_ref, w1_ref, b1_ref, w2_ref, b2_ref, gate_ref, *, inv_hw):
    sig = _channel_gate(x_ref[...], w1_ref, b1_ref, w2_ref, b2_ref, inv_hw=inv_hw)
    gate_ref[...] = sig[:, None, :].astype(gate_ref.dtype)        # (Bt, 1, C)


def _apply_kernel(x_ref, w1_ref, b1_ref, w2_ref, b2_ref, fp_ref, pool_ref,
                  *, inv_hw, inv_c):
    x = x_ref[...]
    sig = _channel_gate(x, w1_ref, b1_ref, w2_ref, b2_ref, inv_hw=inv_hw)
    fp = sig[:, :, None] * x.astype(jnp.float32)                  # (Bt, C, HW)
    fp_ref[...] = fp.astype(fp_ref.dtype)
    # Epilogue fusion: SpatialAttention.agg_channel pooling of chan_att*f,
    # cat([max, avg], dim=1), computed before the block leaves VMEM.
    cmax = jnp.max(fp, axis=1)                                    # (Bt, HW)
    cavg = jnp.sum(fp, axis=1) * inv_c                            # (Bt, HW)
    pool = jnp.concatenate([cmax[:, None, :], cavg[:, None, :]], axis=1)
    pool_ref[...] = pool.astype(pool_ref.dtype)                   # (Bt, 2, HW)


# --------------------------------------------------------------------------
# Tiling / spec helpers
# --------------------------------------------------------------------------

def _vmem_capacity_bytes():
    try:
        return int(pltpu.get_tpu_info().vmem_capacity_bytes)
    except Exception:
        return 64 * 1024 * 1024            # conservative (v7x per-core size)


def _pick_block_b(B, bytes_per_batch):
    cap = _vmem_capacity_bytes()
    budget = cap // 4                      # in+out blocks, double-buffered
    bt = max(1, budget // max(2 * bytes_per_batch, 1))
    # Keep >= 2 grid steps so dimension_semantics=("parallel",) can shard the
    # batch axis across v7x's two TensorCores; negligible cost on 1-TC chips.
    bt = min(bt, max(1, pl.cdiv(B, 2)))
    return int(min(bt, B))


def _compiler_params():
    cap = _vmem_capacity_bytes()
    return pltpu.CompilerParams(
        dimension_semantics=("parallel",),
        vmem_limit_bytes=int(min(cap * 3 // 4, 96 * 1024 * 1024)),
    )


def _in_specs(bt, C, HW, M):
    return [
        pl.BlockSpec((bt, C, HW), lambda i: (i, 0, 0)),   # x (lane-dense HW)
        pl.BlockSpec((M, C), lambda i: (0, 0)),           # w1 (out, in)
        pl.BlockSpec((1, M), lambda i: (0, 0)),           # b1
        pl.BlockSpec((C, M), lambda i: (0, 0)),           # w2 (out, in)
        pl.BlockSpec((1, C), lambda i: (0, 0)),           # b2
    ]


# --------------------------------------------------------------------------
# Wrappers
# --------------------------------------------------------------------------

def channel_attention(x, w1, b1, w2, b2, *, block_b=None):
    """ChannelAttention.forward: broadcast attention map (B, C, H, W).

    Weights use PyTorch nn.Linear layout: w1 (M, C), b1 (M,), w2 (C, M), b2 (C,).
    """
    B, C, H, W = x.shape
    HW = H * W
    M = w1.shape[0]
    itemsize = x.dtype.itemsize
    x2 = x.reshape(B, C, HW)

    bytes_per_batch = C * HW * itemsize + C * itemsize     # x block + gate row
    bt = _pick_block_b(B, bytes_per_batch) if block_b is None else block_b
    grid = (pl.cdiv(B, bt),)

    gate = pl.pallas_call(
        functools.partial(_gate_kernel, inv_hw=1.0 / float(HW)),
        out_shape=jax.ShapeDtypeStruct((B, 1, C), x.dtype),
        grid_spec=pltpu.PrefetchScalarGridSpec(
            num_scalar_prefetch=0,
            grid=grid,
            in_specs=_in_specs(bt, C, HW, M),
            out_specs=pl.BlockSpec((bt, 1, C), lambda i: (i, 0, 0)),
        ),
        compiler_params=_compiler_params(),
    )(x2, w1, b1.reshape(1, M), w2, b2.reshape(1, C))

    # The PyTorch module's .repeat over (H, W) is pure layout; broadcasting in
    # XLA avoids writing B*C*H*W redundant floats from the kernel.
    return jnp.broadcast_to(gate.reshape(B, C, 1, 1), (B, C, H, W))


def channel_attention_apply(x, w1, b1, w2, b2, *, block_b=None):
    """Fused CBAM production path.

    Returns (chan_att * f, spatial_pool) where spatial_pool is
    cat([channel-max, channel-mean], dim=1) of chan_att * f — exactly the
    tensor SpatialAttention's conv consumes next.
    """
    B, C, H, W = x.shape
    HW = H * W
    M = w1.shape[0]
    itemsize = x.dtype.itemsize
    x2 = x.reshape(B, C, HW)

    bytes_per_batch = (2 * C + 2) * HW * itemsize          # x + fp + pool blocks
    bt = _pick_block_b(B, bytes_per_batch) if block_b is None else block_b
    grid = (pl.cdiv(B, bt),)

    fp2, pool2 = pl.pallas_call(
        functools.partial(_apply_kernel,
                          inv_hw=1.0 / float(HW), inv_c=1.0 / float(C)),
        out_shape=(jax.ShapeDtypeStruct((B, C, HW), x.dtype),
                   jax.ShapeDtypeStruct((B, 2, HW), x.dtype)),
        grid_spec=pltpu.PrefetchScalarGridSpec(
            num_scalar_prefetch=0,
            grid=grid,
            in_specs=_in_specs(bt, C, HW, M),
            out_specs=(pl.BlockSpec((bt, C, HW), lambda i: (i, 0, 0)),
                       pl.BlockSpec((bt, 2, HW), lambda i: (i, 0, 0))),
        ),
        compiler_params=_compiler_params(),
    )(x2, w1, b1.reshape(1, M), w2, b2.reshape(1, C))

    return fp2.reshape(B, C, H, W), pool2.reshape(B, 2, H, W)


# --------------------------------------------------------------------------
# Pure-JAX reference (PyTorch ChannelAttention semantics)
# --------------------------------------------------------------------------

def channel_attention_ref(x, w1, b1, w2, b2):
    avg = jnp.mean(x, axis=(2, 3))
    mxp = jnp.max(x, axis=(2, 3))

    def bottleneck(v):
        h = jnp.maximum(v @ w1.T + b1, 0.0)
        return h @ w2.T + b2

    sig = jax.nn.sigmoid(bottleneck(avg) + bottleneck(mxp))
    return jnp.broadcast_to(sig[:, :, None, None], x.shape)


# --------------------------------------------------------------------------
# Demo / self-test
# --------------------------------------------------------------------------

if __name__ == "__main__":
    # Shapes consistent with CriticNetwork's CBAM(8, reduction_ratio=4):
    # n_channels_in = 8, middle_layer_size = 2; small spatial (16x16), batch 2.
    B, C, H, W = 2, 8, 16, 16
    reduction_ratio = 4
    M = int(C / float(reduction_ratio))   # = 2

    key = jax.random.PRNGKey(0)
    kx, k1, k2, k3, k4 = jax.random.split(key, 5)

    x = jax.random.normal(kx, (B, C, H, W), dtype=jnp.float32)

    # nn.Linear-style uniform init, PyTorch weight layout (out_features, in_features).
    lim1 = 1.0 / math.sqrt(C)
    lim2 = 1.0 / math.sqrt(M)
    w1 = jax.random.uniform(k1, (M, C), jnp.float32, -lim1, lim1)   # Linear(C -> M)
    b1 = jax.random.uniform(k2, (M,), jnp.float32, -lim1, lim1)
    w2 = jax.random.uniform(k3, (C, M), jnp.float32, -lim2, lim2)   # Linear(M -> C)
    b2 = jax.random.uniform(k4, (C,), jnp.float32, -lim2, lim2)

    ref = channel_attention_ref(x, w1, b1, w2, b2)

    # 1) Module-semantics output (broadcast attention map).
    out = jax.block_until_ready(channel_attention(x, w1, b1, w2, b2))
    assert out.shape == (B, C, H, W)
    assert jnp.allclose(out, ref, atol=1e-4, rtol=1e-4), "attention map mismatch"

    # 2) Fused production path: chan_att*f plus the SpatialAttention pooling.
    fp, spool = channel_attention_apply(x, w1, b1, w2, b2)
    fp, spool = jax.block_until_ready((fp, spool))
    ref_fp = ref * x
    ref_pool = jnp.concatenate(
        [jnp.max(ref_fp, axis=1, keepdims=True),
         jnp.mean(ref_fp, axis=1, keepdims=True)], axis=1)
    assert fp.shape == (B, C, H, W) and spool.shape == (B, 2, H, W)
    assert jnp.allclose(fp, ref_fp, atol=1e-4, rtol=1e-4), "fused chan_att*f mismatch"
    assert jnp.allclose(spool, ref_pool, atol=1e-4, rtol=1e-4), "spatial pooling mismatch"

    print("KERNEL_OK")
</pallas_src>

<mosaic_0001>
module attributes {stable_mosaic.version = 11 : i64} {
  func.func @_gate_kernel(%arg0: i32, %arg1: memref<1x8x256xf32, #tpu.memory_space<vmem>>, %arg2: memref<2x8xf32, #tpu.memory_space<vmem>>, %arg3: memref<1x2xf32, #tpu.memory_space<vmem>>, %arg4: memref<8x2xf32, #tpu.memory_space<vmem>>, %arg5: memref<1x8xf32, #tpu.memory_space<vmem>>, %arg6: memref<1x1x8xf32, #tpu.memory_space<vmem>>) attributes {dimension_semantics = [#tpu.dimension_semantics<parallel>], iteration_bounds = array<i64: 2>, scalar_prefetch = 0 : i64, scratch_operands = 0 : i64, tpu.core_type = #tpu.core_type<tc>, window_params = [{transform_indices = @transform_0, window_bounds = array<i64: 1, 8, 256>}, {pipeline_mode = #tpu.pipeline_mode<synchronous>, transform_indices = @transform_1, window_bounds = array<i64: 2, 8>}, {pipeline_mode = #tpu.pipeline_mode<synchronous>, transform_indices = @transform_2, window_bounds = array<i64: 1, 2>}, {pipeline_mode = #tpu.pipeline_mode<synchronous>, transform_indices = @transform_3, window_bounds = array<i64: 8, 2>}, {pipeline_mode = #tpu.pipeline_mode<synchronous>, transform_indices = @transform_4, window_bounds = array<i64: 1, 8>}, {transform_indices = @transform_5, window_bounds = array<i64: 1, 1, 8>}]} {
    %c0 = arith.constant 0 : index
    %c0_0 = arith.constant 0 : index
    %c0_1 = arith.constant 0 : index
    %0 = vector.load %arg1[%c0, %c0_0, %c0_1] : memref<1x8x256xf32, #tpu.memory_space<vmem>>, vector<1x8x256xf32>
    %cst = arith.constant dense<0.000000e+00> : vector<1x8xf32>
    %1 = vector.multi_reduction <add>, %0, %cst [2] : vector<1x8x256xf32> to vector<1x8xf32>
    %cst_2 = arith.constant 3.906250e-03 : f32
    %2 = vector.broadcast %cst_2 : f32 to vector<1x8xf32>
    %3 = arith.mulf %1, %2 : vector<1x8xf32>
    %cst_3 = arith.constant dense<0xFF800000> : vector<1x8xf32>
    %4 = vector.multi_reduction <maximumf>, %0, %cst_3 [2] : vector<1x8x256xf32> to vector<1x8xf32>
    %5 = tpu.concatenate %3, %4 in 0 : vector<1x8xf32>, vector<1x8xf32> -> vector<2x8xf32>
    %c0_4 = arith.constant 0 : index
    %c0_5 = arith.constant 0 : index
    %6 = vector.load %arg2[%c0_4, %c0_5] : memref<2x8xf32, #tpu.memory_space<vmem>>, vector<2x8xf32>
    %c0_6 = arith.constant 0 : index
    %c0_7 = arith.constant 0 : index
    %7 = vector.load %arg3[%c0_6, %c0_7] : memref<1x2xf32, #tpu.memory_space<vmem>>, vector<1x2xf32>
    %c0_8 = arith.constant 0 : index
    %c0_9 = arith.constant 0 : index
    %8 = vector.load %arg4[%c0_8, %c0_9] : memref<8x2xf32, #tpu.memory_space<vmem>>, vector<8x2xf32>
    %c0_10 = arith.constant 0 : index
    %c0_11 = arith.constant 0 : index
    %9 = vector.load %arg5[%c0_10, %c0_11] : memref<1x8xf32, #tpu.memory_space<vmem>>, vector<1x8xf32>
    %10 = vector.shape_cast %5 : vector<2x8xf32> to vector<2x1x8xf32>
    %11 = vector.shape_cast %6 : vector<2x8xf32> to vector<1x2x8xf32>
    %12 = vector.broadcast %10 : vector<2x1x8xf32> to vector<2x2x8xf32>
    %13 = vector.broadcast %11 : vector<1x2x8xf32> to vector<2x2x8xf32>
    %14 = arith.mulf %12, %13 : vector<2x2x8xf32>
    %cst_12 = arith.constant dense<0.000000e+00> : vector<2x2xf32>
    %15 = vector.multi_reduction <add>, %14, %cst_12 [2] : vector<2x2x8xf32> to vector<2x2xf32>
    %16 = vector.broadcast %7 : vector<1x2xf32> to vector<2x2xf32>
    %17 = arith.addf %15, %16 : vector<2x2xf32>
    %cst_13 = arith.constant 0.000000e+00 : f32
    %18 = vector.broadcast %cst_13 : f32 to vector<2x2xf32>
    %19 = arith.maximumf %17, %18 : vector<2x2xf32>
    %20 = vector.shape_cast %19 : vector<2x2xf32> to vector<2x1x2xf32>
    %21 = vector.shape_cast %8 : vector<8x2xf32> to vector<1x8x2xf32>
    %22 = vector.broadcast %20 : vector<2x1x2xf32> to vector<2x8x2xf32>
    %23 = vector.broadcast %21 : vector<1x8x2xf32> to vector<2x8x2xf32>
    %24 = arith.mulf %22, %23 : vector<2x8x2xf32>
    %cst_14 = arith.constant dense<0.000000e+00> : vector<2x8xf32>
    %25 = vector.multi_reduction <add>, %24, %cst_14 [2] : vector<2x8x2xf32> to vector<2x8xf32>
    %26 = vector.broadcast %9 : vector<1x8xf32> to vector<2x8xf32>
    %27 = arith.addf %25, %26 : vector<2x8xf32>
    %28 = vector.extract_strided_slice %27 {offsets = [0, 0], sizes = [1, 8], strides = [1, 1]} : vector<2x8xf32> to vector<1x8xf32>
    %29 = vector.extract_strided_slice %27 {offsets = [1, 0], sizes = [1, 8], strides = [1, 1]} : vector<2x8xf32> to vector<1x8xf32>
    %30 = arith.addf %28, %29 : vector<1x8xf32>
    %31 = math.absf %30 : vector<1x8xf32>
    %cst_15 = arith.constant 0.000000e+00 : f32
    %32 = vector.broadcast %cst_15 : f32 to vector<1x8xf32>
    %33 = arith.subf %32, %31 : vector<1x8xf32>
    %34 = math.exp %33 : vector<1x8xf32>
    %cst_16 = arith.constant 0.000000e+00 : f32
    %35 = vector.broadcast %cst_16 : f32 to vector<1x8xf32>
    %36 = arith.cmpf oge, %30, %35 : vector<1x8xf32>
    %cst_17 = arith.constant 1.000000e+00 : f32
    %37 = vector.broadcast %cst_17 : f32 to vector<1x8xf32>
    %38 = arith.addf %37, %34 : vector<1x8xf32>
    %cst_18 = arith.constant 1.000000e+00 : f32
    %39 = vector.broadcast %cst_18 : f32 to vector<1x8xf32>
    %40 = arith.divf %39, %38 : vector<1x8xf32>
    %cst_19 = arith.constant 1.000000e+00 : f32
    %41 = vector.broadcast %cst_19 : f32 to vector<1x8xf32>
    %42 = arith.addf %41, %34 : vector<1x8xf32>
    %43 = arith.divf %34, %42 : vector<1x8xf32>
    %44 = arith.select %36, %40, %43 : vector<1x8xi1>, vector<1x8xf32>
    %45 = vector.shape_cast %44 : vector<1x8xf32> to vector<1x1x8xf32>
    %c0_20 = arith.constant 0 : index
    %c0_21 = arith.constant 0 : index
    %c0_22 = arith.constant 0 : index
    %46 = vector.load %arg6[%c0_20, %c0_21, %c0_22] : memref<1x1x8xf32, #tpu.memory_space<vmem>>, vector<1x1x8xf32>
    tpu.vector_store %arg6[%c0_20, %c0_21, %c0_22], %45 {strides = array<i32>} : memref<1x1x8xf32, #tpu.memory_space<vmem>>, vector<1x1x8xf32>,
    return
  }
  func.func @transform_0(%arg0: i32) -> (i32, i32, i32) {
    %c0_i32 = arith.constant 0 : i32
    %c0_i32_0 = arith.constant 0 : i32
    %c0_i32_1 = arith.constant 0 : i32
    return %arg0, %c0_i32, %c0_i32_0 : i32, i32, i32
  }
  func.func @transform_1(%arg0: i32) -> (i32, i32) {
    %c0_i32 = arith.constant 0 : i32
    %c0_i32_0 = arith.constant 0 : i32
    %c0_i32_1 = arith.constant 0 : i32
    return %c0_i32, %c0_i32_0 : i32, i32
  }
  func.func @transform_2(%arg0: i32) -> (i32, i32) {
    %c0_i32 = arith.constant 0 : i32
    %c0_i32_0 = arith.constant 0 : i32
    %c0_i32_1 = arith.constant 0 : i32
    return %c0_i32, %c0_i32_0 : i32, i32
  }
  func.func @transform_3(%arg0: i32) -> (i32, i32) {
    %c0_i32 = arith.constant 0 : i32
    %c0_i32_0 = arith.constant 0 : i32
    %c0_i32_1 = arith.constant 0 : i32
    return %c0_i32, %c0_i32_0 : i32, i32
  }
  func.func @transform_4(%arg0: i32) -> (i32, i32) {
    %c0_i32 = arith.constant 0 : i32
    %c0_i32_0 = arith.constant 0 : i32
    %c0_i32_1 = arith.constant 0 : i32
    return %c0_i32, %c0_i32_0 : i32, i32
  }
  func.func @transform_5(%arg0: i32) -> (i32, i32, i32) {
    %c0_i32 = arith.constant 0 : i32
    %c0_i32_0 = arith.constant 0 : i32
    %c0_i32_1 = arith.constant 0 : i32
    return %arg0, %c0_i32, %c0_i32_0 : i32, i32, i32
  }
}

</mosaic_0001>

<bundles_post_ra>
// kernel: tpu_custom_call.1
= control target key start
LH: loop header
LB: loop body
LE: loop exit
PB: predicated region body
PF: predicated region fallthrough
CT: control target
= control target key end

     0   :  { %10 = vsyncpa [#allocation3], 0  ;;  %s1086_s0 = inlined_call_operand.hbm [shape: f32[2,8,256], index: 0, kind: input, shape index: {}]   ;;  %s1087_s1 = inlined_call_operand.vmem [shape: f32[2,8], index: 1, kind: input, shape index: {}]   ;;  %s1088_s2 = inlined_call_operand.vmem [shape: f32[1,2], index: 2, kind: input, shape index: {}]   ;;  %s1089_s3 = inlined_call_operand.vmem [shape: f32[8,2], index: 3, kind: input, shape index: {}]   ;;  %s1090_s4 = inlined_call_operand.vmem [shape: f32[1,8], index: 4, kind: input, shape index: {}]   ;;  %s1091_s5 = inlined_call_operand.hbm [shape: f32[2,1,8], index: 5, kind: output, shape index: {}]  }
   0x1   :  { %12 = vsyncpa [#allocation3 + $0x1], 0 }
   0x2   :  { %13 = vsyncpa [#allocation4], 0 }
   0x3   :  { %15 = vsyncpa [#allocation4 + $0x1], 0  ;;  %s875_s18 = smov 0   ;;  %s877_s19 = smov 0  }
   0x4   :  { %s879_s20 = smov 0   ;;  %s881_s21 = smov 0  }
   0x5 LB: > { %s896_s22 = sadd.s32 4294967295, %s839_s21   ;;  %s675_s23 = sadd.s32 4294967294, %s839_s21   ;;  %s839_s21 = sphi %s881_s21, %s1106_s21   ;;  %s835_s20 = sphi %s879_s20, %s1105_s20   ;;  %s831_s19 = sphi %s877_s19, %s1104_s19   ;;  %s827_s18 = sphi %s875_s18, %s1103_s18  }
   0x6   : > { %s900_s24 = sadd.s32 1, %s839_s21   ;;  %s28_s25 = sadd.s32 1, %s835_s20 }
   0x7   : > { %s25_s26 = ssub.s32 %s839_s21, %s900_s24  ;;  %p35_p0 = scmp.ne.s32.totalorder %s835_s20, %s831_s19 }
   0x8   : > { %p26_p1 = scmp.eq.s32.totalorder %s25_s26, 0  ;;  %p36_p2 = scmp.eq.s32.totalorder %s839_s21, 0 }
   0x9   : > { %p41_p3 = scmp.ne.s32.totalorder %s831_s19, %s827_s18  ;;  %p42_p4 = scmp.eq.s32.totalorder %s896_s22, 0 }
   0xa   : > { %s912_s27 = scalar_select %p26_p1, %s835_s20, %s28_s25  }
   0xb   : > { %p914_p5 = por %p36_p2, %p35_p0  ;;  %p918_p6 = por %p42_p4, %p41_p3 }
   0xc   : > { %p149_p7 = scmp.eq.s32.totalorder %s896_s22, 1  ;;  %p155_p8 = scmp.eq.s32.totalorder %s675_s23, 1 }
   0xd   : > { %p701_p10 = scmp.lt.s32.totalorder %s839_s21, 2  ;;  %s187_s7 = sand.u32 1, %s835_s20  }
   0xe   : > { %p925_p11 = por %p149_p7, %p35_p0  ;;  %p929_p12 = por %p155_p8, %p41_p3 }
   0xf   : > { %s688_s8 = sshll.u32 %s839_s21, 8  ;;  %s678_s9 = sshll.u32 %s187_s7, 4 }
  0x10   : > { %s1095_s30 = scalar_select %p925_p11, 1, 0 }
  0x11   : > { %s1096_s6 = scalar_select %p929_p12, 1, 0 }
  0x12   : > { %s938_s12 = scalar_lea.hbm %s1086_s0, %s688_s8  ;;  %s191_s13 = scalar_lea.vmem [#allocation2], %s678_s9 }
  0x13   : > { %s199_s14 = sshll.u32 %s191_s13, 4  ;;  %p942_p13 = pnand %p701_p10, %p914_p5  ;;  %s946_s14 = int_to_ptr.vmem [resolvable:$true] %s199_s14 }
  0x14   : > { %s188_s16 = scalar_lea.sflag [#allocation3], %s187_s7  ;;  %s743_s17 = scalar_lea.hbm %s938_s12, 256 }
  0x15   : > { %p744_p2 = scmp.ne.s32.totalorder %s938_s12, %s743_s17  ;;  %p745_p3 = pneg %p942_p13 }
  0x16   : > { %s748_s26 = scalar_lea.hbm %s1086_s0, 512  ;;  %p749_p5 = scmp.lt.u32.totalorder %s938_s12, %s1086_s0 }
  0x17   : > { %p746_p4 = pnand %p745_p3, %p744_p2  ;;  %p750_p8 = scmp.lt.u32.totalorder %s748_s26, %s743_s17 }
  0x18   : > { %p752_p9 = scmp.lt.u32.totalorder %s743_s17, %s938_s12 }
  0x19   : > { %p747_p7 = pneg %p746_p4  ;;  %p751_p10 = por %p750_p8, %p749_p5 }
  0x1b   : > { %p753_p0 = por %p752_p9, %p751_p10 }
  0x1d   : > { %p754_p1 = pnand %p753_p0, %p747_p7 }
  0x1f   : > { %757 = shalt.err (!%p754_p1)
}
  0x20   : > { %s758_s7 = scalar_lea.vmem %s946_s14, 256  ;;  %s841_s9 = smov [#allocation2]  }
  0x21   : > { %p759_p2 = scmp.ne.s32.totalorder %s946_s14, %s758_s7  ;;  %s763_s10 = sshll.u32 %s841_s9, 4  ;;  %s764_s10 = int_to_ptr.vmem [resolvable:$false] %s763_s10 }
  0x22   : > { %s765_s11 = scalar_lea.vmem %s764_s10, 512  ;;  %p766_p11 = scmp.lt.s32.totalorder %s946_s14, %s764_s10 }
  0x23   : > { %p761_p4 = pnand %p759_p2, %p745_p3  ;;  %p767_p5 = scmp.lt.s32.totalorder %s765_s11, %s758_s7 }
  0x25   : > { %p762_p12 = pneg %p761_p4  ;;  %p768_p8 = por %p767_p5, %p766_p11 }
  0x27   : > { %p769_p9 = pnand %p768_p8, %p762_p12 }
  0x29   : > { %772 = shalt.err (!%p769_p9)
}
  0x2a   : > { %696 = dma.hbm_to_vmem [thread:$0]  (!%p942_p13), %s938_s12, 256, %s946_s14, %s188_s16  }
  0x2b   : > { %p1098_p0 = scmp.lt.s32.totalorder %s839_s21, 3  ;;  %p1099_p1 = scmp.ge.s32.totalorder %s839_s21, 1 }
  0x2d   : > { %p205_p3 = pnand %p1099_p1, %p1098_p0 }
  0x2e   : > { %s980_s13 = sand.u32 (!%p205_p3), 1, %s831_s19  }
  0x2f   : > { %208 = sbr.rel (%p205_p3) target bundleno = 851 (0x353), region = 40  ;;  %s682_s17 = sshll.u32 (!%p205_p3), %s980_s13, 4 }
  0x30   : > { %s211_s23 = scalar_lea.sflag (!%p205_p3), [#allocation3], %s980_s13  ;;  %s214_s25 = scalar_lea.vmem (!%p205_p3), [#allocation2], %s682_s17 }
  0x36   : > { %818 = dma.done.wait (%p918_p6), %s211_s23, 256  }
  0x37   : > { %820 = vsyncadd (%p918_p6), %s211_s23, 4294967040  ;;  %v250_v0 = vlaneseq  ;;  %v240_v6 = vld [vmem:[%s214_s25] sm:$0xff]  ;;  %v241_v7 = vld [vmem:[%s214_s25 + $0x8] sm:$0xff]  ;;  %v842_v26 = vmov 1966171168   ;;  %vm263_vm0 = vcmask 1040384  }
  0x38   : > { %v267_v8 = vld [vmem:[%s1089_s3] sm:$0xff]  ;;  %v242_v9 = vadd.f32 %v241_v7, %v240_v6  ;;  %v246_v11 = vmax.f32 %v240_v6, %v241_v7  ;;  %v271_v27 = vunpack.c.l.s4 %v842_v26  ;;  %vm304_vm1 = vcmask 58368   ;;  %s685_s7 = sshll.u32 %s896_s22, 4  ;;  %s239_s9 = scalar_lea.vmem [#allocation5], %s980_s13 }
  0x39   : > { %v251_v1 = vand.u32 127, %v250_v0  ;;  %v253_v2 = vshrl.u32 %v250_v0, 7  ;;  %v683_v17 = vld [vmem:[%s1088_s2] ss:$0 sm:$0xff]  ;;  %v843_v47 = vmov 0   ;;  %vm533_vm2 = vcmask 1041409   ;;  %s1042_s23 = scalar_lea.hbm %s1091_s5, %s685_s7 }
  0x3a   : > { %243 = vadd.xlane.f32.xlu0 %v242_v9  ;;  %v272_v29 = vunpack.c.0.s8 %v271_v27  ;;  %v265_v39 = vld [vmem:[%s1087_s1] sm:$0x3]  ;;  %737 = vset.pattern.permute.xlu1 %v843_v47  ;;  %vm535_vm3 = vcmask 1042434   ;;  %vm537_vm4 = vcmask 1043459   ;;  %vm539_vm5 = vcmask 1044484   ;;  %s609_s10 = sshll.u32 %s239_s9, 4  ;;  %s1044_s10 = int_to_ptr.vmem [resolvable:$true] %s609_s10 }
  0x3b   : > { %v988_v3 = vsub.s32 %v251_v1, %v253_v2  ;;  %v294_v4 = vsub.s32 0, %v253_v2  ;;  %v334_v5 = vsub.s32 1, %v253_v2  ;;  %v341_v13 = vsub.s32 2, %v253_v2  ;;  %738 = vset.pattern.permute.xlu0 %v843_v47  ;;  %s597_s25 = scalar_lea.sflag [#allocation4], %s980_s13  ;;  %s773_s12 = scalar_lea.vmem %s1044_s10, 16 }
  0x3c   : > { %v355_v15 = vsub.s32 4, %v253_v2  ;;  %v348_v18 = vsub.s32 3, %v253_v2  ;;  %v369_v19 = vsub.s32 6, %v253_v2  ;;  %v362_v20 = vsub.s32 5, %v253_v2  ;;  %p774_p6 = scmp.ne.s32.totalorder %s1044_s10, %s773_s12  ;;  %p1100_p11 = scmp.ne.s32.totalorder %s1095_s30, 0 }
  0x3d   : > { %v328_v10 = vrot.slane %v267_v8, %v294_v4  ;;  %v335_v12 = vrot.slane %v267_v8, %v334_v5  ;;  %v342_v14 = vrot.slane %v267_v8, %v341_v13  ;;  %v376_v24 = vsub.s32 7, %v253_v2  ;;  %s844_s22 = smov [#allocation5]  }
  0x3e   : > { %247 = vmax.xlane.f32.xlu0 %v246_v11  ;;  %v356_v16 = vrot.slane %v267_v8, %v355_v15  ;;  %v349_v21 = vrot.slane %v267_v8, %v348_v18  ;;  %v370_v22 = vrot.slane %v267_v8, %v369_v19  ;;  %v363_v23 = vrot.slane %v267_v8, %v362_v20  ;;  %p775_p12 = pnand %p774_p6, %p1100_p11  ;;  %s777_s14 = sshll.u32 %s844_s22, 4  ;;  %s778_s14 = int_to_ptr.vmem [resolvable:$false] %s777_s14 }
  0x3f   : > { %330 = vbcast.lane.b32.xlu1 %v328_v10, 256  ;;  %v377_v25 = vrot.slane %v267_v8, %v376_v24  ;;  %v275_v31 = vsub.s32 %v272_v29, %v253_v2  ;;  %vm541_vm6 = vcmask 1045509   ;;  %vm543_vm7 = vcmask 1046534   ;;  %s779_s29 = scalar_lea.vmem %s778_s14, 32  ;;  %p780_p7 = scmp.lt.s32.totalorder %s1044_s10, %s778_s14 }
  0x40   : > { %vm545_vm8 = vcmask 1047559   ;;  %vm556_vm9 = vcmask 15360   ;;  %vm594_vm11 = vcmask 57344   ;;  %p776_p13 = pneg %p775_p12  ;;  %p781_p10 = scmp.lt.s32.totalorder %s779_s29, %s773_s12 }
  0x42   : > { %p782_p2 = por %p781_p10, %p780_p7 }
  0x43   : > { %337 = vbcast.lane.b32.xlu1 %v335_v12, 256 }
  0x44   : > { %p783_p4 = pnand %p782_p2, %p776_p13 }
  0x47   : > { %344 = vbcast.lane.b32.xlu1 %v342_v14, 256 }
  0x4b   : > { %358 = vbcast.lane.b32.xlu1 %v356_v16, 256 }
  0x54   : > { %317 = vbcast.lane.b32.xlu0 %v683_v17, 256 }
  0x58   : > { %351 = vbcast.lane.b32.xlu0 %v349_v21, 256 }
  0x5c   : > { %365 = vbcast.lane.b32.xlu0 %v363_v23, 256 }
  0x60   : > { %379 = vbcast.lane.b32.xlu0 %v377_v25, 256 }
  0xb1   : > { %v331_v48 = vpop.permute.xlu1 %330 }
  0xb5   : > { %v338_v49 = vpop.permute.xlu1 %337 }
  0xb9   : > { %v345_v50 = vpop.permute.xlu1 %344 }
  0xbd   : > { %v359_v51 = vpop.permute.xlu1 %358 }
  0xc7   : > { %v244_v28 = vpop.xlane.xlu0 %243 }
  0xc8   : > { %v245_v30 = vmul.f32 0.00390625, %v244_v28 }
  0xca   : > { %v255_v33 = vrot.slane %v245_v30, %v988_v3 }
  0xcb   : > { %v248_v32 = vpop.xlane.xlu0 %247 }
  0xcc   : > { %v261_v34 = vrot.slane %v248_v32, %v988_v3 }
  0xce   : > { %v264_v35 = vsel %vm263_vm0, %v255_v33, %v261_v34 }
  0xcf   : > { %v276_v36 = vrot.slane %v264_v35, %v275_v31  ;;  %v318_v52 = vpop.permute.xlu0 %317 }
  0xd1   : > { %v277_v37 = vcombine.high %v276_v36, %v276_v36  ;;  %v284_v38 = vrot.slane %v276_v36, %v275_v31 }
  0xd3   : > { %v295_v40 = vrot.slane %v284_v38, %v294_v4  ;;  %v291_v41 = vrot.slane %v277_v37, %v275_v31  ;;  %v352_v63 = vpop.permute.xlu0 %351 }
  0xd5   : > { %v302_v42 = vmul.f32 %v295_v40, %v265_v39  ;;  %v299_v43 = vrot.slane %v291_v41, %v294_v4 }
  0xd7   : > { %v305_v44 = vsel %vm304_vm1, %v302_v42, 0.0  ;;  %v303_v45 = vmul.f32 %v299_v43, %v265_v39  ;;  %v366_v5 = vpop.permute.xlu0 %365 }
  0xd8   : > { %306 = vadd.xlane.f32.xlu1 %v305_v44 }
  0xd9   : > { %v308_v46 = vsel %vm304_vm1, %v303_v45, 0.0 }
  0xdb   : > { %v380_v10 = vpop.permute.xlu0 %379 }
  0xdc   : > { %309 = vadd.xlane.f32.xlu1 %v308_v46 }
  0xed   : > { %372 = vbcast.lane.b32.xlu1 %v370_v22, 256 }
 0x165   : > { %v307_v53 = vpop.xlane.xlu1 %306 }
 0x166   : > { %v320_v54 = vadd.f32 %v318_v52, %v307_v53 }
 0x168   : > { %v322_v55 = vmax.f32 %v320_v54, 0.0 }
 0x169   : > { %v310_v56 = vpop.xlane.xlu1 %309 }
 0x16a   : > { %v321_v57 = vadd.f32 %v318_v52, %v310_v56  ;;  %v390_v58 = vmul.f32 %v338_v49, %v322_v55  ;;  %v389_v59 = vmul.f32 %v331_v48, %v322_v55  ;;  %v391_v61 = vmul.f32 %v345_v50, %v322_v55 }
 0x16b   : > { %v392_v0 = vmul.f32 %v352_v63, %v322_v55  ;;  %v393_v2 = vmul.f32 %v359_v51, %v322_v55  ;;  %v394_v6 = vmul.f32 %v366_v5, %v322_v55  ;;  %v396_v12 = vmul.f32 %v380_v10, %v322_v55 }
 0x16c   : > { %v323_v60 = vmax.f32 %v321_v57, 0.0  ;;  %425 = vperm.xlu0 %738, %v390_v58   ;;  %422 = vperm.xlu1 %737, %v389_v59  }
 0x16d   : > { %v373_v7 = vpop.permute.xlu1 %372 }
 0x16e   : > { %v397_v62 = vmul.f32 %v331_v48, %v323_v60  ;;  %v398_v1 = vmul.f32 %v338_v49, %v323_v60  ;;  %v399_v4 = vmul.f32 %v345_v50, %v323_v60  ;;  %v400_v8 = vmul.f32 %v352_v63, %v323_v60 }
 0x16f   : > { %v395_v9 = vmul.f32 %v373_v7, %v322_v55  ;;  %v401_v11 = vmul.f32 %v359_v51, %v323_v60  ;;  %v402_v13 = vmul.f32 %v366_v5, %v323_v60  ;;  %v403_v14 = vmul.f32 %v373_v7, %v323_v60 }
 0x170   : > { %428 = vperm.xlu0 %738, %v391_v61   ;;  %446 = vperm.xlu1 %737, %v397_v62   ;;  %v404_v15 = vmul.f32 %v380_v10, %v323_v60 }
 0x174   : > { %431 = vperm.xlu0 %738, %v392_v0   ;;  %449 = vperm.xlu1 %737, %v398_v1   ;;  %v684_v0 = vld [vmem:[%s1090_s4] ss:$0 sm:$0xff] }
 0x178   : > { %434 = vperm.xlu0 %738, %v393_v2   ;;  %452 = vperm.xlu1 %737, %v399_v4  }
 0x17c   : > { %437 = vperm.xlu0 %738, %v394_v6   ;;  %455 = vperm.xlu1 %737, %v400_v8  }
 0x180   : > { %440 = vperm.xlu0 %738, %v395_v9   ;;  %458 = vperm.xlu1 %737, %v401_v11  }
 0x184   : > { %443 = vperm.xlu0 %738, %v396_v12   ;;  %461 = vperm.xlu1 %737, %v402_v13  }
 0x188   : > { %464 = vperm.xlu1 %737, %v403_v14  }
 0x18c   : > { %467 = vperm.xlu1 %737, %v404_v15  }
 0x1eb   : > { %v426_v16 = vpop.permute.xlu0 %425  ;;  %v423_v17 = vpop.permute.xlu1 %422 }
 0x1ec   : > { %v472_v25 = vrot.slane %v423_v17, %v988_v3  ;;  %v476_v26 = vrot.slane %v426_v16, %v988_v3 }
 0x1ee   : > { %v534_v32 = vsel %vm533_vm2, %v476_v26, %v472_v25 }
 0x1ef   : > { %v429_v18 = vpop.permute.xlu0 %428  ;;  %v447_v19 = vpop.permute.xlu1 %446 }
 0x1f0   : > { %v480_v28 = vrot.slane %v429_v18, %v988_v3  ;;  %v504_v47 = vrot.slane %v447_v19, %v988_v3 }
 0x1f2   : > { %v536_v35 = vsel %vm535_vm3, %v480_v28, %v534_v32 }
 0x1f3   : > { %v432_v20 = vpop.permute.xlu0 %431  ;;  %v450_v21 = vpop.permute.xlu1 %449 }
 0x1f4   : > { %v484_v29 = vrot.slane %v432_v20, %v988_v3  ;;  %v508_v43 = vrot.slane %v450_v21, %v988_v3 }
 0x1f6   : > { %v538_v37 = vsel %vm537_vm4, %v484_v29, %v536_v35  ;;  %v547_v52 = vsel %vm533_vm2, %v508_v43, %v504_v47 }
 0x1f7   : > { %v435_v22 = vpop.permute.xlu0 %434  ;;  %v453_v23 = vpop.permute.xlu1 %452 }
 0x1f8   : > { %v488_v30 = vrot.slane %v435_v22, %v988_v3  ;;  %v512_v45 = vrot.slane %v453_v23, %v988_v3 }
 0x1fa   : > { %v540_v38 = vsel %vm539_vm5, %v488_v30, %v538_v37  ;;  %v548_v54 = vsel %vm535_vm3, %v512_v45, %v547_v52 }
 0x1fb   : > { %v438_v24 = vpop.permute.xlu0 %437  ;;  %v456_v27 = vpop.permute.xlu1 %455 }
 0x1fc   : > { %v492_v33 = vrot.slane %v438_v24, %v988_v3  ;;  %v516_v48 = vrot.slane %v456_v27, %v988_v3 }
 0x1fe   : > { %v542_v40 = vsel %vm541_vm6, %v492_v33, %v540_v38  ;;  %v549_v56 = vsel %vm537_vm4, %v516_v48, %v548_v54 }
 0x1ff   : > { %v441_v31 = vpop.permute.xlu0 %440  ;;  %v459_v34 = vpop.permute.xlu1 %458 }
 0x200   : > { %v496_v36 = vrot.slane %v441_v31, %v988_v3  ;;  %v520_v50 = vrot.slane %v459_v34, %v988_v3 }
 0x202   : > { %v544_v44 = vsel %vm543_vm7, %v496_v36, %v542_v40  ;;  %v550_v57 = vsel %vm539_vm5, %v520_v50, %v549_v56 }
 0x203   : > { %v444_v39 = vpop.permute.xlu0 %443  ;;  %v462_v41 = vpop.permute.xlu1 %461 }
 0x204   : > { %v500_v42 = vrot.slane %v444_v39, %v988_v3  ;;  %v524_v53 = vrot.slane %v462_v41, %v988_v3 }
 0x206   : > { %v546_v46 = vsel %vm545_vm8, %v500_v42, %v544_v44  ;;  %v551_v59 = vsel %vm541_vm6, %v524_v53, %v550_v57 }
 0x207   : > { %v557_v49 = vsel %vm556_vm9, %v546_v46, 0.0  ;;  %v465_v51 = vpop.permute.xlu1 %464 }
 0x208   : > { %558 = vadd.xlane.f32.xlu0 %v557_v49  ;;  %v528_v55 = vrot.slane %v465_v51, %v988_v3 }
 0x20a   : > { %v552_v61 = vsel %vm543_vm7, %v528_v55, %v551_v59 }
 0x20b   : > { %v468_v58 = vpop.permute.xlu1 %467 }
 0x20c   : > { %v532_v60 = vrot.slane %v468_v58, %v988_v3 }
 0x20e   : > { %v553_v62 = vsel %vm545_vm8, %v532_v60, %v552_v61 }
 0x20f   : > { %v560_v63 = vsel %vm556_vm9, %v553_v62, 0.0 }
 0x210   : > { %561 = vadd.xlane.f32.xlu1 %v560_v63 }
 0x21e   : > { %569 = vbcast.lane.b32.xlu0 %v684_v0, 256 }
 0x295   : > { %v559_v1 = vpop.xlane.xlu0 %558 }
 0x299   : > { %v570_v2 = vpop.permute.xlu0 %569 }
 0x29a   : > { %v572_v5 = vadd.f32 %v570_v2, %v559_v1 }
 0x29d   : > { %v562_v4 = vpop.xlane.xlu1 %561 }
 0x29e   : > { %v573_v6 = vadd.f32 %v570_v2, %v562_v4 }
 0x2a0   : > { %v574_v7 = vadd.f32 %v573_v6, %v572_v5 }
 0x2a2   : > { %v575_v8 = vand.u32 2147483647, %v574_v7  ;;  %vm579_vm10 = vcmp.ge.f32.partialorder %v574_v7, 0.0 }
 0x2a4   : > { %v576_v9 = vsub.f32 0.0, %v575_v8 }
 0x2a6   : > { %v577_v10 = vmul.f32 1.442695, %v576_v9 }
 0x2a8   : > { %739 = vpow2.f32 %v577_v10 }
 0x2b2   : > { %v740_v11 = vpop.eup %739 }
 0x2b3   : > { %v580_v12 = vadd.f32 1.0, %v740_v11 }
 0x2b5   : > { %741 = vrcp.f32 %v580_v12 }
 0x2bf   : > { %v742_v13 = vpop.eup %741 }
 0x2c0   : > { %v583_v14 = vmul.f32 %v742_v13, %v740_v11 }
 0x2c2   : > { %v584_v15 = vsel %vm579_vm10, %v742_v13, %v583_v14 }
 0x2c3   : > { %587 = vperm.xlu1 %737, %v584_v15  }
 0x342   : > { %v588_v16 = vpop.permute.xlu1 %587 }
 0x343   : > { %v592_v17 = vrot.slane %v588_v16, %v988_v3 }
 0x345   : > { %595 = vst.msk [vmem:[%s239_s9] sm:$0x1] %vm594_vm11, %v592_v17 }
 0x346   : > { %786 = shalt.err (!%p783_p4)
}
 0x347   : > { %s787_s13 = scalar_lea.hbm %s1042_s23, 16  ;;  %s791_s26 = scalar_lea.hbm %s1091_s5, 32 }
 0x348   : > { %p788_p5 = scmp.ne.s32.totalorder %s1042_s23, %s787_s13  ;;  %p792_p0 = scmp.lt.u32.totalorder %s1042_s23, %s1091_s5 }
 0x349   : > { %p793_p1 = scmp.lt.u32.totalorder %s791_s26, %s787_s13  ;;  %p795_p6 = scmp.lt.u32.totalorder %s787_s13, %s1042_s23 }
 0x34a   : > { %p789_p8 = pnand %p788_p5, %p1100_p11 }
 0x34b   : > { %p794_p3 = por %p793_p1, %p792_p0 }
 0x34c   : > { %p790_p9 = pneg %p789_p8 }
 0x34d   : > { %p796_p12 = por %p795_p6, %p794_p3 }
 0x34f   : > { %p797_p13 = pnand %p796_p12, %p790_p9 }
 0x351   : > { %800 = shalt.err (!%p797_p13)
}
 0x352   : > { %691 = dma.vmem_to_hbm [thread:$0]  (%p1100_p11), %s1044_s10, 16, %s1042_s23, %s597_s25  }
 0x353 PF: > { %s621_s7 = sand.u32 1, %s827_s18   ;;  %p1101_p7 = scmp.ne.s32.totalorder %s1096_s6, 0 }
 0x354   : > { %p1102_p10 = scmp.ge.s32.totalorder %s839_s21, 2  ;;  %s622_s9 = scalar_lea.sflag [#allocation4], %s621_s7 }
 0x356   : > { %p698_p2 = pnand %p1102_p10, %p1101_p7 }
 0x358   : > { %822 = dma.done.wait (!%p698_p2), %s622_s9, 16  }
 0x359   : > { %824 = vsyncadd (!%p698_p2), %s622_s9, 4294967280  ;;  %p18_p4 = scmp.ge.s32.totalorder %s900_s24, 4   ;;  %s1103_s18 = smov %s831_s19 }
 0x35a   : > { %s1104_s19 = smov %s835_s20  ;;  %s1105_s20 = smov %s912_s27 }
 0x35b   : > { %s1106_s21 = smov %s900_s24  ;;  %20 = sbr.rel (!%p18_p4) target bundleno = 5 (0x5), region = 85 }
 0x362   :  { %626 = vsyncpa [#allocation3], 1 }
 0x363   :  { %628 = vsyncpa [#allocation3 + $0x1], 1 }
 0x364   :  { %629 = vsyncpa [#allocation4], 1 }
 0x365   :  { %631 = vsyncpa [#allocation4 + $0x1], 1 }

</bundles_post_ra>
